<compile_context>
chip_gen: v5e
topology: v5e:2x2
jax: 0.10.0
libtpu: 0.0.40
codegen_flags: <defaults>
</compile_context>

<pallas_src>
import math

import jax
import jax.numpy as jnp
from jax.experimental import pallas as pl
from jax.experimental.pallas import tpu as pltpu

LANE = 128      # TPU lane width (last dim of every VMEM tile)
SUBLANE = 8     # TPU sublane granularity (second-to-last dim)


def _round_up(n, m):
    return ((n + m - 1) // m) * m


# ---------------------------------------------------------------------------
# Exact collapse of the purely-linear stack:
#   y = (((x W1 + b1) W2 + b2) ... ) = x (W1 W2 ...) + fold(biases)
# All operands are at most (width x width) <= (128 x 128); this is a one-time
# cost independent of the batch size.
# ---------------------------------------------------------------------------
def collapse_params(params):
    ws, bs = params["w"], params["b"]
    w_eff, b_eff = ws[0], bs[0]
    for w, b in zip(ws[1:], bs[1:]):
        w_eff = jnp.dot(w_eff, w, preferred_element_type=jnp.float32)
        b_eff = jnp.dot(b_eff, w, preferred_element_type=jnp.float32) + b
    return w_eff, b_eff            # (in_N, out_N), (out_N,)


# ---------------------------------------------------------------------------
# Kernel: transposed, lane-dense batched affine transform.
#   xt_ref : (in_pad, TB)      — batch on the lane axis
#   wt_ref : (out_rows, in_pad) — W_eff^T, sublane-padded, resident in VMEM
#   bt_ref : (out_rows, 1)      — b_eff column, resident in VMEM
#   o_ref  : (out_N, TB)        — lane-dense output tile (unmasked lanes)
# ---------------------------------------------------------------------------
def make_nn2_kernel(out_N):
    def kernel(xt_ref, wt_ref, bt_ref, o_ref):
        acc = jnp.dot(wt_ref[...], xt_ref[...],
                      preferred_element_type=jnp.float32)
        acc = acc + bt_ref[...]                 # lane-broadcast bias add (VPU)
        o_ref[...] = acc[:out_N, :]             # drop sublane padding rows
    return kernel


# ---------------------------------------------------------------------------
# Wrapper
# ---------------------------------------------------------------------------
def nn2_forward(x, params, *, in_N, width, depth, out_N,
                batch_tile=1024, min_pallas_batch=256):
    """x: (B, in_N) float32.  params: {"w": [...], "b": [...]} (w stored (in, out))."""
    assert x.ndim == 2 and x.shape[1] == in_N
    assert in_N >= 1 and width >= 1 and out_N >= 1 and depth >= 0
    x = x.astype(jnp.float32)
    B = x.shape[0]

    # One-time exact collapse of the linear stack (review item #1).
    w_eff, b_eff = collapse_params(params)

    # Tiny-batch fallback: the fixed pallas_call + layout overhead dwarfs the
    # sub-microsecond of useful work (review item #9).
    if B < min_pallas_batch:
        return jnp.dot(x, w_eff, preferred_element_type=jnp.float32) + b_eff

    in_pad = _round_up(in_N, SUBLANE)
    out_rows = _round_up(out_N, SUBLANE)

    # Batch tile lives on the lane axis -> must be a multiple of 128.
    tb = min(_round_up(batch_tile, LANE), _round_up(B, LANE))
    # v7x: keep >= 2 grid steps so the "parallel" axis can use both TensorCores.
    if B > LANE and pl.cdiv(B, tb) < 2:
        tb = _round_up(pl.cdiv(B, 2), LANE)
    grid_b = pl.cdiv(B, tb)
    b_pad = grid_b * tb

    # Transposed, zero-padded layouts (padded rows of W_eff^T are zero, padded
    # batch columns are sliced away below, so numerics are unchanged).
    x_t = jnp.zeros((in_pad, b_pad), jnp.float32).at[:in_N, :B].set(x.T)
    wt = jnp.zeros((out_rows, in_pad), jnp.float32).at[:out_N, :in_N].set(w_eff.T)
    bt = jnp.zeros((out_rows, 1), jnp.float32).at[:out_N, 0].set(b_eff)

    flops = 2 * b_pad * in_pad * out_rows
    bytes_accessed = 4 * (x_t.size + wt.size + bt.size + out_N * b_pad)

    out_t = pl.pallas_call(
        make_nn2_kernel(out_N),
        out_shape=jax.ShapeDtypeStruct((out_N, b_pad), jnp.float32),
        grid=(grid_b,),
        in_specs=[
            pl.BlockSpec((in_pad, tb), lambda i: (0, i)),       # activations
            pl.BlockSpec((out_rows, in_pad), lambda i: (0, 0)),  # resident W_eff^T
            pl.BlockSpec((out_rows, 1), lambda i: (0, 0)),       # resident bias
        ],
        out_specs=pl.BlockSpec((out_N, tb), lambda i: (0, i)),   # lane-dense
        compiler_params=pltpu.CompilerParams(
            dimension_semantics=("parallel",)),
        cost_estimate=pl.CostEstimate(flops=flops, transcendentals=0,
                                      bytes_accessed=bytes_accessed),
    )(x_t, wt, bt)

    return out_t[:, :B].T                      # (B, out_N)


# ---------------------------------------------------------------------------
# Init + reference (matches torch nn.Linear semantics; no activation in NN2)
# ---------------------------------------------------------------------------
def init_params(key, in_N, width, depth, out_N):
    dims = [(in_N, width)] + [(width, width)] * depth + [(width, out_N)]
    ws, bs = [], []
    for fan_in, fan_out in dims:
        key, kw, kb = jax.random.split(key, 3)
        bound = 1.0 / math.sqrt(fan_in)
        ws.append(jax.random.uniform(kw, (fan_in, fan_out), jnp.float32,
                                     minval=-bound, maxval=bound))
        bs.append(jax.random.uniform(kb, (fan_out,), jnp.float32,
                                     minval=-bound, maxval=bound))
    return {"w": ws, "b": bs}


def reference_forward(x, params):
    h = x
    for w, b in zip(params["w"], params["b"]):
        h = jnp.dot(h, w, preferred_element_type=jnp.float32) + b
    return h


if __name__ == "__main__":
    IN_N, WIDTH, DEPTH, OUT_N = 4, 64, 2, 1   # NN2(in_N=4, width=64, depth=2, out_N=1)

    key = jax.random.PRNGKey(0)
    key, kx1, kx2 = jax.random.split(key, 3)
    params = init_params(key, IN_N, WIDTH, DEPTH, OUT_N)

    # Batch large enough to take the Pallas path (2 parallel 512-row tiles,
    # non-multiple of the tile size to exercise the padded edge block).
    B1 = 1000
    x1 = jax.random.normal(kx1, (B1, IN_N), dtype=jnp.float32)
    out1 = jax.block_until_ready(
        nn2_forward(x1, params, in_N=IN_N, width=WIDTH, depth=DEPTH, out_N=OUT_N))
    ref1 = reference_forward(x1, params)
    assert out1.shape == (B1, OUT_N)
    assert jnp.allclose(out1, ref1, atol=1e-4, rtol=1e-4)

    # Tiny batch exercises the XLA small-batch fallback path.
    B2 = 8
    x2 = jax.random.normal(kx2, (B2, IN_N), dtype=jnp.float32)
    out2 = jax.block_until_ready(
        nn2_forward(x2, params, in_N=IN_N, width=WIDTH, depth=DEPTH, out_N=OUT_N))
    ref2 = reference_forward(x2, params)
    assert out2.shape == (B2, OUT_N)
    assert jnp.allclose(out2, ref2, atol=1e-4, rtol=1e-4)

    print("KERNEL_OK")
</pallas_src>

<mosaic_0001>
module attributes {stable_mosaic.version = 11 : i64} {
  func.func @kernel(%arg0: i32, %arg1: memref<8x512xf32, #tpu.memory_space<vmem>>, %arg2: memref<8x8xf32, #tpu.memory_space<vmem>>, %arg3: memref<8x1xf32, #tpu.memory_space<vmem>>, %arg4: memref<1x512xf32, #tpu.memory_space<vmem>>) attributes {dimension_semantics = [#tpu.dimension_semantics<parallel>], iteration_bounds = array<i64: 2>, scalar_prefetch = 0 : i64, scratch_operands = 0 : i64, tpu.core_type = #tpu.core_type<tc>, window_params = [{transform_indices = @transform_0, window_bounds = array<i64: 8, 512>}, {pipeline_mode = #tpu.pipeline_mode<synchronous>, transform_indices = @transform_1, window_bounds = array<i64: 8, 8>}, {pipeline_mode = #tpu.pipeline_mode<synchronous>, transform_indices = @transform_2, window_bounds = array<i64: 8, 1>}, {transform_indices = @transform_3, window_bounds = array<i64: 1, 512>}]} {
    %c0 = arith.constant 0 : index
    %c0_0 = arith.constant 0 : index
    %0 = vector.load %arg2[%c0, %c0_0] : memref<8x8xf32, #tpu.memory_space<vmem>>, vector<8x8xf32>
    %c0_1 = arith.constant 0 : index
    %c0_2 = arith.constant 0 : index
    %1 = vector.load %arg1[%c0_1, %c0_2] : memref<8x512xf32, #tpu.memory_space<vmem>>, vector<8x512xf32>
    %cst = arith.constant dense<0.000000e+00> : vector<8x512xf32>
    %2 = tpu.matmul %0, %1, %cst {dimension_numbers = #tpu.dot_dimension_numbers<[1], [0], [0], [1], [0, 0, 1, 1], [], []>} : vector<8x8xf32>, vector<8x512xf32>, vector<8x512xf32> -> vector<8x512xf32>
    %c0_3 = arith.constant 0 : index
    %c0_4 = arith.constant 0 : index
    %3 = vector.load %arg3[%c0_3, %c0_4] : memref<8x1xf32, #tpu.memory_space<vmem>>, vector<8x1xf32>
    %4 = vector.broadcast %3 : vector<8x1xf32> to vector<8x512xf32>
    %5 = arith.addf %2, %4 : vector<8x512xf32>
    %6 = vector.extract_strided_slice %5 {offsets = [0, 0], sizes = [1, 512], strides = [1, 1]} : vector<8x512xf32> to vector<1x512xf32>
    %c0_5 = arith.constant 0 : index
    %c0_6 = arith.constant 0 : index
    %7 = vector.load %arg4[%c0_5, %c0_6] : memref<1x512xf32, #tpu.memory_space<vmem>>, vector<1x512xf32>
    tpu.vector_store %arg4[%c0_5, %c0_6], %6 {strides = array<i32>} : memref<1x512xf32, #tpu.memory_space<vmem>>, vector<1x512xf32>,
    return
  }
  func.func @transform_0(%arg0: i32) -> (i32, i32) {
    %c0_i32 = arith.constant 0 : i32
    %c0_i32_0 = arith.constant 0 : i32
    return %c0_i32, %arg0 : i32, i32
  }
  func.func @transform_1(%arg0: i32) -> (i32, i32) {
    %c0_i32 = arith.constant 0 : i32
    %c0_i32_0 = arith.constant 0 : i32
    %c0_i32_1 = arith.constant 0 : i32
    return %c0_i32, %c0_i32_0 : i32, i32
  }
  func.func @transform_2(%arg0: i32) -> (i32, i32) {
    %c0_i32 = arith.constant 0 : i32
    %c0_i32_0 = arith.constant 0 : i32
    %c0_i32_1 = arith.constant 0 : i32
    return %c0_i32, %c0_i32_0 : i32, i32
  }
  func.func @transform_3(%arg0: i32) -> (i32, i32) {
    %c0_i32 = arith.constant 0 : i32
    %c0_i32_0 = arith.constant 0 : i32
    return %c0_i32, %arg0 : i32, i32
  }
}

</mosaic_0001>

<bundles_post_ra>
// kernel: tpu_custom_call.1
= control target key start
LH: loop header
LB: loop body
LE: loop exit
PB: predicated region body
PF: predicated region fallthrough
CT: control target
= control target key end

     0   :  { %8 = vsyncpa [#allocation3], 0  ;;  %s710_s0 = inlined_call_operand.hbm [shape: f32[8,1024], index: 0, kind: input, shape index: {}]   ;;  %s711_s1 = inlined_call_operand.vmem [shape: f32[8,8], index: 1, kind: input, shape index: {}]   ;;  %s712_s2 = inlined_call_operand.vmem [shape: f32[8,1], index: 2, kind: input, shape index: {}]   ;;  %s713_s3 = inlined_call_operand.hbm [shape: f32[1,1024], index: 3, kind: output, shape index: {}]  }
   0x1   :  { %10 = vsyncpa [#allocation3 + $0x1], 0 }
   0x2   :  { %11 = vsyncpa [#allocation4], 0 }
   0x3   :  { %13 = vsyncpa [#allocation4 + $0x1], 0  ;;  %s576_s12 = smov 0   ;;  %s578_s13 = smov 0  }
   0x4   :  { %s580_s14 = smov 0   ;;  %s582_s15 = smov 0  }
   0x5 LB: > { %s597_s16 = sadd.s32 4294967295, %s553_s15   ;;  %s391_s17 = sadd.s32 4294967294, %s553_s15   ;;  %s553_s15 = sphi %s582_s15, %s723_s15   ;;  %s549_s14 = sphi %s580_s14, %s722_s14   ;;  %s545_s13 = sphi %s578_s13, %s721_s13   ;;  %s541_s12 = sphi %s576_s12, %s720_s12  }
   0x6   : > { %s601_s18 = sadd.s32 1, %s553_s15   ;;  %s26_s19 = sadd.s32 1, %s549_s14 }
   0x7   : > { %s23_s20 = ssub.s32 %s553_s15, %s601_s18  ;;  %p33_p0 = scmp.ne.s32.totalorder %s549_s14, %s545_s13 }
   0x8   : > { %p24_p1 = scmp.eq.s32.totalorder %s23_s20, 0  ;;  %p34_p2 = scmp.eq.s32.totalorder %s553_s15, 0 }
   0x9   : > { %p39_p3 = scmp.ne.s32.totalorder %s545_s13, %s541_s12  ;;  %p40_p4 = scmp.eq.s32.totalorder %s597_s16, 0 }
   0xa   : > { %s613_s21 = scalar_select %p24_p1, %s549_s14, %s26_s19  }
   0xb   : > { %p615_p5 = por %p34_p2, %p33_p0  ;;  %p619_p6 = por %p40_p4, %p39_p3 }
   0xc   : > { %p105_p7 = scmp.eq.s32.totalorder %s597_s16, 1  ;;  %p111_p8 = scmp.eq.s32.totalorder %s391_s17, 1 }
   0xd   : > { %p421_p10 = scmp.lt.s32.totalorder %s553_s15, 2  ;;  %s137_s26 = sand.u32 1, %s549_s14  }
   0xe   : > { %p626_p11 = por %p105_p7, %p33_p0  ;;  %p630_p12 = por %p111_p8, %p39_p3 }
   0xf   : > { %s408_s27 = sshll.u32 %s553_s15, 5  ;;  %s394_s28 = sshll.u32 %s137_s26, 5 }
  0x10   : > { %s146_s4 = scalar_lea.hbm %s710_s0, %s408_s27  ;;  %s141_s6 = scalar_lea.vmem [#allocation2], %s394_s28 }
  0x11   : > { %s148_s5 = sshll.u32 %s146_s4, 4  ;;  %s150_s7 = sshll.u32 %s141_s6, 4  ;;  %s149_s5 = int_to_ptr.hbm [resolvable:$true] %s148_s5  ;;  %s151_s7 = int_to_ptr.vmem [resolvable:$true] %s150_s7 }
  0x12   : > { %p641_p13 = pnand %p421_p10, %p615_p5  ;;  %p397_p0 = scmp.ge.s32.totalorder %s553_s15, 1 }
  0x13   : > { %p155_p1 = scmp.lt.s32.totalorder %s553_s15, 3  ;;  %s138_s9 = scalar_lea.sflag [#allocation3], %s137_s26 }
  0x14   : > { %s457_s10 = sshra.s32 %s149_s5, 4  ;;  %p461_p3 = pneg %p641_p13  ;;  %s458_s10 = int_to_ptr.hbm [resolvable:$true] %s457_s10 }
  0x15   : > { %s459_s11 = scalar_lea.hbm %s458_s10, 32  ;;  %s464_s20 = scalar_lea.hbm %s710_s0, 64 }
  0x16   : > { %p460_p2 = scmp.ne.s32.totalorder %s458_s10, %s459_s11  ;;  %p465_p5 = scmp.lt.s32.totalorder %s458_s10, %s710_s0 }
  0x17   : > { %p466_p8 = scmp.lt.s32.totalorder %s464_s20, %s459_s11 }
  0x18   : > { %p462_p4 = pnand %p461_p3, %p460_p2 }
  0x19   : > { %p467_p10 = por %p466_p8, %p465_p5 }
  0x1a   : > { %p463_p7 = pneg %p462_p4 }
  0x1c   : > { %p468_p9 = pnand %p467_p10, %p463_p7 }
  0x1e   : > { %471 = shalt.err (!%p468_p9)
}
  0x1f   : > { %416 = dma.hbm_to_vmem [thread:$0]  (!%p641_p13), %s149_s5, 512, %s151_s7, %s138_s9  }
  0x20   : > { %p156_p2 = pnand %p397_p0, %p155_p1 }
  0x21   : > { %s662_s26 = sand.u32 (!%p156_p2), 1, %s545_s13  }
  0x22   : > { %159 = sbr.rel (%p156_p2) target bundleno = 184 (0xb8), region = 32  ;;  %s398_s28 = sshll.u32 (!%p156_p2), %s662_s26, 5 }
  0x23   : > { %s162_s29 = scalar_lea.sflag (!%p156_p2), [#allocation3], %s662_s26  ;;  %s165_s30 = scalar_lea.vmem (!%p156_p2), [#allocation2], %s398_s28 }
  0x27   : > { %532 = dma.done.wait (%p619_p6), %s162_s29, 512  }
  0x28   : > { %534 = vsyncadd (%p619_p6), %s162_s29, 4294966784  ;;  %v555_v0 = vmov 0   ;;  %vm202_vm0 = vcmask 64512   ;;  %v194_v1 = vld [vmem:[%s165_s30 + $0x10] sm:$0xff]  ;;  %v195_v2 = vld [vmem:[%s165_s30 + $0x18] sm:$0xff]  ;;  %s399_s7 = sshll.u32 %s662_s26, 2  ;;  %v300_v13 = vlaneseq }
  0x29   : > { %456 = vset.pattern.permute.xlu0 %v555_v0  ;;  %v191_v3 = vld [vmem:[%s711_s1] sm:$0xff]  ;;  %261 = vmatpush.msra.mxu2 %v194_v1  ;;  %v193_v4 = vld [vmem:[%s165_s30 + $0x8] sm:$0xff]  ;;  %s405_s8 = sshll.u32 %s597_s16, 2  ;;  %vm293_vm1 = vcmask 1040384   ;;  %vm295_vm2 = vcmask 1042434   ;;  %s188_s17 = scalar_lea.vmem [#allocation5], %s399_s7 }
  0x2a   : > { %281 = vmatpush.msra.mxu3 %v195_v2  ;;  %v192_v5 = vld [vmem:[%s165_s30] sm:$0xff]  ;;  %402 = vmatmul.msk.f32.vlgmr.msra.gmra.mxu2 %vm202_vm0, %v191_v3  ;;  %s316_s11 = scalar_lea.hbm %s713_s3, %s405_s8  ;;  %s318_s19 = sshll.u32 %s188_s17, 4  ;;  %vm297_vm3 = vcmask 1041408   ;;  %vm302_vm4 = vcmp.lt.s32.totalorder %v300_v13, 512  ;;  %s319_s19 = int_to_ptr.vmem [resolvable:$true] %s318_s19 }
  0x2b   : > { %403 = vmatmul.msk.f32.vlgmr.msra.gmra.mxu3 %vm202_vm0, %v191_v3  ;;  %v196_v6 = vld [vmem:[%s712_s2] sm:$0xff]  ;;  %241 = vmatpush.msra.mxu1 %v193_v4  ;;  %s320_s20 = sshll.u32 %s316_s11, 4  ;;  %s306_s16 = scalar_lea.sflag [#allocation4], %s662_s26  ;;  %s321_s20 = int_to_ptr.hbm [resolvable:$true] %s320_s20 }
  0x2c   : > { %221 = vmatpush.msra.mxu0 %v192_v5  ;;  %401 = vmatmul.msk.f32.vlgmr.msra.gmra.mxu1 %vm202_vm0, %v191_v3  ;;  %s501_s22 = sshra.s32 %s321_s20, 4  ;;  %s507_s30 = scalar_lea.hbm %s713_s3, 8  ;;  %s502_s22 = int_to_ptr.hbm [resolvable:$true] %s501_s22 }
  0x2d   : > { %400 = vmatmul.msk.f32.vlgmr.msra.gmra.mxu0 %vm202_vm0, %v191_v3  ;;  %199 = vperm.xlu0 %456, %v196_v6   ;;  %s503_s27 = scalar_lea.hbm %s502_s22, 4  ;;  %p508_p0 = scmp.lt.s32.totalorder %s502_s22, %s713_s3 }
  0x2e   : > { %p504_p6 = scmp.ne.s32.totalorder %s502_s22, %s503_s27  ;;  %p509_p1 = scmp.lt.s32.totalorder %s507_s30, %s503_s27 }
  0x30   : > { %p505_p9 = pnand %p504_p6, %p626_p11  ;;  %p510_p3 = por %p509_p1, %p508_p0 }
  0x32   : > { %p506_p13 = pneg %p505_p9 }
  0x34   : > { %p511_p4 = pnand %p510_p3, %p506_p13 }
  0x9f   : > { %v200_v7 = vpop.permute.xlu0 %199 }
  0xa9   : > { %v243_v8 = vpop.f32.mrf.mxu1 }
  0xaa   : > { %v244_v9 = vadd.f32 %v243_v8, %v200_v7  ;;  %v223_v10 = vpop.f32.mrf.mxu0 }
  0xab   : > { %v224_v15 = vadd.f32 %v223_v10, %v200_v7 }
  0xac   : > { %v290_v14 = vrot.slane %v244_v9, 7 }
  0xad   : > { %v263_v11 = vpop.f32.mrf.mxu2 }
  0xae   : > { %v283_v12 = vpop.f32.mrf.mxu3  ;;  %v264_v16 = vadd.f32 %v263_v11, %v200_v7  ;;  %v294_v20 = vsel %vm293_vm1, %v224_v15, %v290_v14 }
  0xaf   : > { %v284_v17 = vadd.f32 %v283_v12, %v200_v7 }
  0xb0   : > { %v291_v18 = vrot.slane %v264_v16, 6 }
  0xb1   : > { %v292_v19 = vrot.slane %v284_v17, 5 }
  0xb3   : > { %v296_v21 = vsel %vm295_vm2, %v291_v18, %v292_v19 }
  0xb4   : > { %v298_v22 = vsel %vm297_vm3, %v294_v20, %v296_v21 }
  0xb5   : > { %304 = vst.msk [vmem:[%s188_s17] sm:$0xf] %vm302_vm4, %v298_v22 }
  0xb6   : > { %514 = shalt.err (!%p511_p4)
}
  0xb7   : > { %411 = dma.vmem_to_hbm [thread:$0]  (%p626_p11), %s319_s19, 64, %s321_s20, %s306_s16  }
  0xb8 PF: > { %s332_s26 = sand.u32 1, %s541_s12   ;;  %p719_p7 = scmp.ge.s32.totalorder %s553_s15, 2 }
  0xb9   : > { %s333_s6 = scalar_lea.sflag [#allocation4], %s332_s26 }
  0xba   : > { %p418_p5 = pnand %p719_p7, %p630_p12 }
  0xbc   : > { %p419_p8 = pneg %p418_p5 }
  0xbe   : > { %536 = dma.done.wait (%p419_p8), %s333_s6, 64  }
  0xbf   : > { %538 = vsyncadd (%p419_p8), %s333_s6, 4294967232  ;;  %p16_p10 = scmp.ge.s32.totalorder %s601_s18, 4   ;;  %s720_s12 = smov %s545_s13 }
  0xc0   : > { %s721_s13 = smov %s549_s14  ;;  %s722_s14 = smov %s613_s21 }
  0xc1   : > { %s723_s15 = smov %s601_s18  ;;  %18 = sbr.rel (!%p16_p10) target bundleno = 5 (0x5), region = 77 }
  0xc6   :  { %339 = vsyncpa [#allocation3], 1 }
  0xc7   :  { %341 = vsyncpa [#allocation3 + $0x1], 1 }
  0xc8   :  { %342 = vsyncpa [#allocation4], 1 }
  0xc9   :  { %344 = vsyncpa [#allocation4 + $0x1], 1 }

</bundles_post_ra>
